<compile_context>
chip_gen: v7x
topology: tpu7x:2x2x1
jax: 0.10.0
libtpu: 0.0.40
codegen_flags: <defaults>
</compile_context>

<pallas_src>
import jax
import jax.numpy as jnp
from jax.experimental import pallas as pl
from jax.experimental.pallas import tpu as pltpu


def _prompt_concat_kernel(prefix_ref, ctx_ref, suffix_ref, out_ref):
    # prefix_ref: (C_BLK, 1,     D)  per-class SOS-token embedding block
    # ctx_ref:    (n_ctx, D)         shared learnable context (resident in VMEM)
    # suffix_ref: (C_BLK, L_suf, D)  per-class classname + EOS/pad embeddings
    # out_ref:    (C_BLK, T,     D)  assembled prompt block, T = 1 + n_ctx + L_suf
    c_blk = out_ref.shape[0]
    n_ctx, d = ctx_ref.shape

    # Direct slice stores into the output block: avoids materializing a
    # (C_BLK, T, D) concat temp in vregs.
    out_ref[:, 0:1, :] = prefix_ref[...].astype(out_ref.dtype)

    ctx = jnp.broadcast_to(ctx_ref[...][None, :, :], (c_blk, n_ctx, d))
    out_ref[:, 1:1 + n_ctx, :] = ctx.astype(out_ref.dtype)

    out_ref[:, 1 + n_ctx:, :] = suffix_ref[...].astype(out_ref.dtype)


def _choose_c_blk(n_cls, n_ctx, L_suf, D, itemsize,
                  vmem_budget_bytes=16 * 1024 * 1024):
    """Pick how many classes to process per grid step.

    Budget is conservative (16 MiB for double-buffered in+out blocks) so the
    same choice is safe on v7x (64 MiB physical / 32 MiB scoped-default VMEM)
    as well as v5e/v6e. The grid is kept at >= 2 steps so v7x's two
    TensorCores can both get work on the "parallel" axis.
    """
    T = 1 + n_ctx + L_suf
    per_class_bytes = (T + L_suf + 1) * D * itemsize   # out + suffix + prefix
    c = max(1, vmem_budget_bytes // (2 * per_class_bytes))  # 2x: double-buffer
    c = min(c, 512, n_cls)
    if n_cls >= 2:
        c = min(c, pl.cdiv(n_cls, 2))   # keep at least 2 grid steps
    return int(c)


def prompt_learner_forward(token_prefix, ctx, token_suffix, *,
                           c_blk=None, out_dtype=None):
    """Pallas implementation of PromptLearner.forward() ('end' position).

    token_prefix: (n_cls, 1, D)
    ctx:          (n_ctx, D)          (2-D -> expanded to every class, as in torch)
    token_suffix: (n_cls, L_suf, D)
    returns:      (n_cls, 1 + n_ctx + L_suf, D)
    """
    n_cls, _, D = token_prefix.shape
    n_ctx = ctx.shape[0]
    L_suf = token_suffix.shape[1]
    T = 1 + n_ctx + L_suf
    if out_dtype is None:
        out_dtype = token_prefix.dtype

    if c_blk is None:
        c_blk = _choose_c_blk(n_cls, n_ctx, L_suf, D,
                              jnp.dtype(out_dtype).itemsize)
    c_blk = max(1, min(c_blk, n_cls))
    grid = (pl.cdiv(n_cls, c_blk),)

    return pl.pallas_call(
        _prompt_concat_kernel,
        out_shape=jax.ShapeDtypeStruct((n_cls, T, D), out_dtype),
        grid_spec=pl.GridSpec(
            grid=grid,
            in_specs=[
                # C_BLK classes of prefix per step
                pl.BlockSpec((c_blk, 1, D), lambda i: (i, 0, 0)),
                # shared ctx: constant index_map -> stays resident in VMEM
                pl.BlockSpec((n_ctx, D), lambda i: (0, 0)),
                # C_BLK classes of suffix per step
                pl.BlockSpec((c_blk, L_suf, D), lambda i: (i, 0, 0)),
            ],
            out_specs=pl.BlockSpec((c_blk, T, D), lambda i: (i, 0, 0)),
        ),
        compiler_params=pltpu.CompilerParams(
            dimension_semantics=("parallel",),
        ),
    )(token_prefix, ctx, token_suffix)


def reference_forward(token_prefix, ctx, token_suffix):
    n_cls = token_prefix.shape[0]
    ctx_e = jnp.broadcast_to(ctx[None], (n_cls,) + ctx.shape)
    return jnp.concatenate([token_prefix, ctx_e, token_suffix], axis=-2)


if __name__ == "__main__":
    # Small, forward-consistent shapes. n_cls chosen so the class-batched grid
    # has multiple steps (C_BLK auto-picks 8 here -> grid of 2 steps).
    n_cls = 16      # number of classnames
    n_ctx = 8       # number of learnable context tokens
    L_suf = 7       # suffix length (classname tokens + EOS + pad)
    D = 128         # ctx_dim (= clip_model.ln_final.weight.shape[0])
    dtype = jnp.float32

    key = jax.random.PRNGKey(0)
    k_ctx, k_pre, k_suf = jax.random.split(key, 3)

    # nn.init.normal_(ctx_vectors, std=0.02)
    ctx = (0.02 * jax.random.normal(k_ctx, (n_ctx, D))).astype(dtype)
    # register_buffer('token_prefix', embedding[:, :1, :]) -- synthetic embeddings
    token_prefix = jax.random.normal(k_pre, (n_cls, 1, D)).astype(dtype)
    # register_buffer('token_suffix', embedding[:, 1+n_ctx:, :])
    token_suffix = jax.random.normal(k_suf, (n_cls, L_suf, D)).astype(dtype)

    prompts = prompt_learner_forward(token_prefix, ctx, token_suffix)
    prompts = jax.block_until_ready(prompts)

    expected = reference_forward(token_prefix, ctx, token_suffix)
    assert prompts.shape == (n_cls, 1 + n_ctx + L_suf, D), prompts.shape
    assert jnp.allclose(prompts, expected), "mismatch vs. pure-JAX reference"

    print("KERNEL_OK")
</pallas_src>

<mosaic_0001>
module attributes {stable_mosaic.version = 11 : i64} {
  func.func @_prompt_concat_kernel(%arg0: i32, %arg1: memref<8x1x128xf32, #tpu.memory_space<vmem>>, %arg2: memref<8x128xf32, #tpu.memory_space<vmem>>, %arg3: memref<8x7x128xf32, #tpu.memory_space<vmem>>, %arg4: memref<8x16x128xf32, #tpu.memory_space<vmem>>) attributes {dimension_semantics = [#tpu.dimension_semantics<parallel>], iteration_bounds = array<i64: 2>, scalar_prefetch = 0 : i64, scratch_operands = 0 : i64, tpu.core_type = #tpu.core_type<tc>, window_params = [{transform_indices = @transform_0, window_bounds = array<i64: 8, 1, 128>}, {pipeline_mode = #tpu.pipeline_mode<synchronous>, transform_indices = @transform_1, window_bounds = array<i64: 8, 128>}, {transform_indices = @transform_2, window_bounds = array<i64: 8, 7, 128>}, {transform_indices = @transform_3, window_bounds = array<i64: 8, 16, 128>}]} {
    %c0 = arith.constant 0 : index
    %c0_0 = arith.constant 0 : index
    %c0_1 = arith.constant 0 : index
    %0 = vector.load %arg1[%c0, %c0_0, %c0_1] : memref<8x1x128xf32, #tpu.memory_space<vmem>>, vector<8x1x128xf32>
    %c0_2 = arith.constant 0 : index
    %c0_3 = arith.constant 0 : index
    %c0_4 = arith.constant 0 : index
    %1 = vector.load %arg4[%c0_2, %c0_3, %c0_4] : memref<8x16x128xf32, #tpu.memory_space<vmem>>, vector<8x1x128xf32>
    tpu.vector_store %arg4[%c0_2, %c0_3, %c0_4], %0 {strides = array<i32>} : memref<8x16x128xf32, #tpu.memory_space<vmem>>, vector<8x1x128xf32>,
    %c0_5 = arith.constant 0 : index
    %c0_6 = arith.constant 0 : index
    %2 = vector.load %arg2[%c0_5, %c0_6] : memref<8x128xf32, #tpu.memory_space<vmem>>, vector<8x128xf32>
    %3 = vector.shape_cast %2 : vector<8x128xf32> to vector<1x8x128xf32>
    %4 = vector.shape_cast %3 : vector<1x8x128xf32> to vector<1x8x128xf32>
    %5 = vector.broadcast %4 : vector<1x8x128xf32> to vector<8x8x128xf32>
    %c0_7 = arith.constant 0 : index
    %c1 = arith.constant 1 : index
    %c0_8 = arith.constant 0 : index
    %6 = vector.load %arg4[%c0_7, %c1, %c0_8] : memref<8x16x128xf32, #tpu.memory_space<vmem>>, vector<8x8x128xf32>
    tpu.vector_store %arg4[%c0_7, %c1, %c0_8], %5 {strides = array<i32>} : memref<8x16x128xf32, #tpu.memory_space<vmem>>, vector<8x8x128xf32>,
    %c0_9 = arith.constant 0 : index
    %c0_10 = arith.constant 0 : index
    %c0_11 = arith.constant 0 : index
    %7 = vector.load %arg3[%c0_9, %c0_10, %c0_11] : memref<8x7x128xf32, #tpu.memory_space<vmem>>, vector<8x7x128xf32>
    %c0_12 = arith.constant 0 : index
    %c9 = arith.constant 9 : index
    %c0_13 = arith.constant 0 : index
    %8 = vector.load %arg4[%c0_12, %c9, %c0_13] : memref<8x16x128xf32, #tpu.memory_space<vmem>>, vector<8x7x128xf32>
    tpu.vector_store %arg4[%c0_12, %c9, %c0_13], %7 {strides = array<i32>} : memref<8x16x128xf32, #tpu.memory_space<vmem>>, vector<8x7x128xf32>,
    return
  }
  func.func @transform_0(%arg0: i32) -> (i32, i32, i32) {
    %c0_i32 = arith.constant 0 : i32
    %c0_i32_0 = arith.constant 0 : i32
    %c0_i32_1 = arith.constant 0 : i32
    return %arg0, %c0_i32, %c0_i32_0 : i32, i32, i32
  }
  func.func @transform_1(%arg0: i32) -> (i32, i32) {
    %c0_i32 = arith.constant 0 : i32
    %c0_i32_0 = arith.constant 0 : i32
    %c0_i32_1 = arith.constant 0 : i32
    return %c0_i32, %c0_i32_0 : i32, i32
  }
  func.func @transform_2(%arg0: i32) -> (i32, i32, i32) {
    %c0_i32 = arith.constant 0 : i32
    %c0_i32_0 = arith.constant 0 : i32
    %c0_i32_1 = arith.constant 0 : i32
    return %arg0, %c0_i32, %c0_i32_0 : i32, i32, i32
  }
  func.func @transform_3(%arg0: i32) -> (i32, i32, i32) {
    %c0_i32 = arith.constant 0 : i32
    %c0_i32_0 = arith.constant 0 : i32
    %c0_i32_1 = arith.constant 0 : i32
    return %arg0, %c0_i32, %c0_i32_0 : i32, i32, i32
  }
}

</mosaic_0001>

<bundles_post_ra>
// kernel: tpu_custom_call.1
= control target key start
LH: loop header
LB: loop body
LE: loop exit
PB: predicated region body
PF: predicated region fallthrough
CT: control target
= control target key end

     0   :  { %8 = vsyncpa [#allocation3], 0  ;;  %s615_s0 = inlined_call_operand.vmem [shape: f32[16,1,128], index: 0, kind: input, shape index: {}]   ;;  %s616_s1 = inlined_call_operand.vmem [shape: f32[8,128], index: 1, kind: input, shape index: {}]   ;;  %s617_s2 = inlined_call_operand.vmem [shape: f32[16,7,128], index: 2, kind: input, shape index: {}]   ;;  %s618_s3 = inlined_call_operand.hbm [shape: f32[16,16,128], index: 3, kind: output, shape index: {}]  }
   0x1   :  { %10 = vsyncpa [#allocation3 + $0x1], 0  ;;  %s462_s12 = smov 0   ;;  %s464_s13 = smov 0  }
   0x2   :  { %s466_s14 = smov 0   ;;  %s468_s15 = smov 0  }
   0x3 LB: > { %s483_s16 = sadd.s32 4294967295, %s437_s15   ;;  %s318_s17 = sadd.s32 4294967294, %s437_s15   ;;  %s437_s15 = sphi %s468_s15, %s624_s15   ;;  %s433_s14 = sphi %s466_s14, %s623_s14   ;;  %s429_s13 = sphi %s464_s13, %s622_s13   ;;  %s425_s12 = sphi %s462_s12, %s621_s12  }
   0x4   : > { %s487_s18 = sadd.s32 1, %s437_s15   ;;  %s96_s19 = sadd.s32 1, %s433_s14 }
   0x5   : > { %s93_s20 = ssub.s32 %s437_s15, %s487_s18  ;;  %p106_p0 = scmp.ne.s32.totalorder %s433_s14, %s429_s13 }
   0x6   : > { %p94_p1 = scmp.eq.s32.totalorder %s93_s20, 0  ;;  %p107_p2 = scmp.eq.s32.totalorder %s483_s16, 1 }
   0x7   : > { %p112_p3 = scmp.ne.s32.totalorder %s429_s13, %s425_s12  ;;  %p113_p4 = scmp.eq.s32.totalorder %s318_s17, 1 }
   0x8   : > { %s498_s21 = scalar_select %p94_p1, %s433_s14, %s96_s19  }
   0x9   : > { %p500_p5 = por %p107_p2, %p106_p0  ;;  %p504_p6 = por %p113_p4, %p112_p3 }
   0xa   : > { %p321_p7 = scmp.ge.s32.totalorder %s437_s15, 1  ;;  %p151_p8 = scmp.lt.s32.totalorder %s437_s15, 3 }
   0xc   : > { %p152_p9 = pnand %p321_p7, %p151_p8 }
   0xd   : > { %s176_s24 = sand.u32 (!%p152_p9), 1, %s429_s13   ;;  %s323_s25 = sshll.u32 (!%p152_p9), %s483_s16, 3  ;;  %v207_v0 = vld [vmem:[%s616_s1] sm:$0xff] (!%p152_p9) }
   0xe   : > { %155 = sbr.rel (%p152_p9) target bundleno = 48 (0x30), region = 32  ;;  %s322_s28 = sshll.u32 (!%p152_p9), %s176_s24, 7 }
   0xf   : > { %p180_p10 = scmp.lt.s32.totalorder (!%p152_p9), %s323_s25, 15  ;;  %s517_s29 = scalar_lea.vmem (!%p152_p9), [#allocation2], %s322_s28 }
  0x10   : > { %208 = vst [vmem:[%s517_s29 + $0x1] sm:$0xff] (!%p152_p9), %v207_v0  ;;  %209 = vst [vmem:[%s517_s29 + $0x11] sm:$0xff] (!%p152_p9), %v207_v0  ;;  %s333_s30 = sshll.u32 (!%p152_p9), %s483_s16, 11  ;;  %s247_s4 = sshll.u32 (!%p152_p9), %s517_s29, 4  ;;  %s565_s4 = int_to_ptr.vmem [resolvable:$true] %s247_s4 }
  0x11   : > { %210 = vst [vmem:[%s517_s29 + $0x21] sm:$0xff] (!%p152_p9), %v207_v0  ;;  %211 = vst [vmem:[%s517_s29 + $0x31] sm:$0xff] (!%p152_p9), %v207_v0  ;;  %s561_s20 = scalar_lea.hbm (!%p152_p9), %s618_s3, %s333_s30  ;;  %s375_s16 = scalar_lea.vmem (!%p152_p9), %s565_s4, 2048 }
  0x12   : > { %212 = vst [vmem:[%s517_s29 + $0x41] sm:$0xff] (!%p152_p9), %v207_v0  ;;  %213 = vst [vmem:[%s517_s29 + $0x51] sm:$0xff] (!%p152_p9), %v207_v0  ;;  %p376_p11 = scmp.ne.s32.totalorder (!%p152_p9), %s565_s4, %s375_s16  ;;  %s439_s26 = smov (!%p152_p9), [#allocation2]  }
  0x13   : > { %214 = vst [vmem:[%s517_s29 + $0x61] sm:$0xff] (!%p152_p9), %v207_v0  ;;  %215 = vst [vmem:[%s517_s29 + $0x71] sm:$0xff] (!%p152_p9), %v207_v0  ;;  %s379_s27 = sshll.u32 (!%p152_p9), %s439_s26, 4  ;;  %s380_s27 = int_to_ptr.vmem [resolvable:$false] %s379_s27 }
  0x14   : > { %p377_p12 = pnand (!%p152_p9), %p376_p11, %p500_p5  ;;  %s381_s28 = scalar_lea.vmem (!%p152_p9), %s380_s27, 4096 }
  0x15   : > { %s626_s25 = smov (!%p180_p10, %s323_s25), 15  ;;  %p382_p0 = scmp.lt.s32.totalorder %s565_s4, %s380_s27 }
  0x16   : > { %s182_s7 = scalar_lea.vmem %s615_s0, %s626_s25  ;;  %s325_s8 = sshll.u32 %s626_s25, 3 }
  0x17   : > { %v191_v1 = vld [vmem:[%s182_s7] sm:$0x1]  ;;  %v192_v2 = vld [vmem:[%s182_s7 + $0x1] sm:$0x1]  ;;  %v193_v3 = vld [vmem:[%s182_s7 + $0x2] sm:$0x1]  ;;  %s535_s11 = scalar_lea.vmem %s617_s2, %s325_s8  ;;  %p378_p13 = pneg %p377_p12 }
  0x18   : > { %199 = vst [vmem:[%s517_s29] sm:$0x1] %v191_v1  ;;  %200 = vst [vmem:[%s517_s29 + $0x10] sm:$0x1] %v192_v2  ;;  %v194_v4 = vld [vmem:[%s182_s7 + $0x3] sm:$0x1]  ;;  %s574_s25 = scalar_lea.sflag [#allocation3], %s176_s24  ;;  %p383_p1 = scmp.lt.s32.totalorder %s381_s28, %s375_s16 }
  0x19   : > { %201 = vst [vmem:[%s517_s29 + $0x20] sm:$0x1] %v193_v3  ;;  %v195_v5 = vld [vmem:[%s182_s7 + $0x4] sm:$0x1]  ;;  %v196_v6 = vld [vmem:[%s182_s7 + $0x5] sm:$0x1] }
  0x1a   : > { %202 = vst [vmem:[%s517_s29 + $0x30] sm:$0x1] %v194_v4  ;;  %203 = vst [vmem:[%s517_s29 + $0x40] sm:$0x1] %v195_v5  ;;  %v197_v7 = vld [vmem:[%s182_s7 + $0x6] sm:$0x1]  ;;  %p384_p2 = por %p383_p1, %p382_p0 }
  0x1b   : > { %204 = vst [vmem:[%s517_s29 + $0x50] sm:$0x1] %v196_v6  ;;  %v198_v8 = vld [vmem:[%s182_s7 + $0x7] sm:$0x1]  ;;  %v216_v9 = vld [vmem:[%s535_s11] sm:$0x7f] }
  0x1c   : > { %205 = vst [vmem:[%s517_s29 + $0x60] sm:$0x1] %v197_v7  ;;  %206 = vst [vmem:[%s517_s29 + $0x70] sm:$0x1] %v198_v8  ;;  %v217_v10 = vld [vmem:[%s535_s11 + $0x8] sm:$0x7f]  ;;  %p385_p3 = pnand %p384_p2, %p378_p13 }
  0x1d   : > { %224 = vst [vmem:[%s517_s29 + $0x9] sm:$0x7f] %v216_v9  ;;  %v218_v11 = vld [vmem:[%s535_s11 + $0x10] sm:$0x7f]  ;;  %v219_v12 = vld [vmem:[%s535_s11 + $0x18] sm:$0x7f] }
  0x1e   : > { %225 = vst [vmem:[%s517_s29 + $0x19] sm:$0x7f] %v217_v10  ;;  %226 = vst [vmem:[%s517_s29 + $0x29] sm:$0x7f] %v218_v11  ;;  %v220_v13 = vld [vmem:[%s535_s11 + $0x20] sm:$0x7f] }
  0x1f   : > { %227 = vst [vmem:[%s517_s29 + $0x39] sm:$0x7f] %v219_v12  ;;  %v221_v14 = vld [vmem:[%s535_s11 + $0x28] sm:$0x7f]  ;;  %v222_v15 = vld [vmem:[%s535_s11 + $0x30] sm:$0x7f] }
  0x20   : > { %228 = vst [vmem:[%s517_s29 + $0x49] sm:$0x7f] %v220_v13  ;;  %229 = vst [vmem:[%s517_s29 + $0x59] sm:$0x7f] %v221_v14  ;;  %v223_v16 = vld [vmem:[%s535_s11 + $0x38] sm:$0x7f] }
  0x21   : > { %230 = vst [vmem:[%s517_s29 + $0x69] sm:$0x7f] %v222_v15  ;;  %231 = vst [vmem:[%s517_s29 + $0x79] sm:$0x7f] %v223_v16 }
  0x22   : > { %388 = shalt.err (!%p385_p3)
}
  0x23   : > { %s389_s24 = scalar_lea.hbm %s561_s20, 2048  ;;  %s393_s5 = scalar_lea.hbm %s618_s3, 4096 }
  0x24   : > { %p390_p4 = scmp.ne.s32.totalorder %s561_s20, %s389_s24  ;;  %p394_p9 = scmp.lt.u32.totalorder %s561_s20, %s618_s3 }
  0x25   : > { %p395_p10 = scmp.lt.u32.totalorder %s393_s5, %s389_s24  ;;  %p397_p12 = scmp.lt.u32.totalorder %s389_s24, %s561_s20 }
  0x26   : > { %p391_p7 = pnand %p390_p4, %p500_p5 }
  0x27   : > { %p396_p11 = por %p395_p10, %p394_p9 }
  0x28   : > { %p392_p8 = pneg %p391_p7 }
  0x29   : > { %p398_p13 = por %p397_p12, %p396_p11 }
  0x2b   : > { %p399_p0 = pnand %p398_p13, %p392_p8 }
  0x2d   : > { %402 = shalt.err (!%p399_p0)
}
  0x2e   : > { %s440_s8 = smov 128   ;;  %s441_s9 = smov 8  }
  0x2f   : > { %334 = dma.vmem_to_hbm [thread:$0]  (%p500_p5), %s565_s4, 2048, %s561_s20, %s574_s25, %s440_s8, %s440_s8, %s441_s9  }
  0x30 PF: > { %p340_p1 = scmp.ge.s32.totalorder %s437_s15, 2  ;;  %s262_s10 = sand.u32 1, %s425_s12  }
  0x31   : > { %s263_s11 = scalar_lea.sflag [#allocation3], %s262_s10 }
  0x32   : > { %p337_p2 = pnand %p340_p1, %p504_p6 }
  0x34   : > { %420 = dma.done.wait (!%p337_p2), %s263_s11, 2048  }
  0x35   : > { %422 = vsyncadd (!%p337_p2), %s263_s11, 4294965248  ;;  %p13_p3 = scmp.ge.s32.totalorder %s487_s18, 4   ;;  %s621_s12 = smov %s429_s13 }
  0x36   : > { %s622_s13 = smov %s433_s14  ;;  %s623_s14 = smov %s498_s21 }
  0x37   : > { %s624_s15 = smov %s487_s18  ;;  %15 = sbr.rel (!%p13_p3) target bundleno = 3 (0x3), region = 70 }
  0x3e   :  { %268 = vsyncpa [#allocation3], 1 }
  0x3f   :  { %270 = vsyncpa [#allocation3 + $0x1], 1 }

</bundles_post_ra>
